<compile_context>
chip_gen: v6e
topology: v6e:2x2x1
jax: 0.10.0
libtpu: 0.0.40
codegen_flags: <defaults>
</compile_context>

<pallas_src>
import numpy as np
import jax
import jax.numpy as jnp
from jax.experimental import pallas as pl
from jax.experimental.pallas import tpu as pltpu


# ----------------------------------------------------------------------------
# Kernel
# ----------------------------------------------------------------------------
def _make_mlp_kernel(num_chunks, h_chunk):
    """Fused Linear -> ReLU -> Linear over one batch tile.

    The hidden dimension is processed in `num_chunks` static chunks of width
    `h_chunk`; per-chunk partial products of the second matmul accumulate into
    a VMEM f32 scratch, bounding vreg pressure for large num_hiddens.
    """

    def mlp_kernel(x_ref, w1_ref, b1_ref, w2_ref, b2_ref, o_ref, acc_ref):
        x = x_ref[...]                                   # (tb, num_inputs), compute dtype
        acc_ref[...] = jnp.zeros_like(acc_ref)           # f32 accumulator in VMEM
        for c in range(num_chunks):                      # static, unrolled
            lo = c * h_chunk
            hi = lo + h_chunk
            # hidden chunk: MXU matmul, f32 accumulation
            h = jnp.dot(x, w1_ref[:, lo:hi], preferred_element_type=jnp.float32)
            # bias + ReLU in f32 on the VPU (v5e VPU/EUP have no bf16)
            h = jnp.maximum(h + b1_ref[:, lo:hi], 0.0)
            # second matmul chunk, accumulated in f32
            acc_ref[...] += jnp.dot(h.astype(w2_ref.dtype), w2_ref[lo:hi, :],
                                    preferred_element_type=jnp.float32)
        o_ref[...] = (acc_ref[...] + b2_ref[...]).astype(o_ref.dtype)

    return mlp_kernel


# ----------------------------------------------------------------------------
# Wrapper helpers
# ----------------------------------------------------------------------------
def _physical_vmem_bytes():
    try:
        return int(pltpu.get_tpu_info().vmem_capacity_bytes)
    except Exception:
        return 64 << 20  # conservative default (v7x per-TensorCore)


def _sublane_multiple(dtype):
    # f32 -> 8, bf16 -> 16, int8/fp8 -> 32 (packed sublanes)
    return max(8, 32 // np.dtype(dtype).itemsize)


def _pick_batch_tile(B, max_single_block_batch, tb_large, sub):
    """Return (tb, batch_pad)."""
    if B <= max_single_block_batch:
        tb = ((max(B, sub) + sub - 1) // sub) * sub
        return tb, (-B) % tb
    # >= 2 grid steps so the parallel batch axis can use both v7x TensorCores.
    target = min(tb_large, max(sub, (B // 2) // sub * sub))
    # Prefer a divisor of B (multiple of the sublane quantum): no padded HBM
    # copy of x is ever materialized.
    for d in range(target, sub - 1, -sub):
        if B % d == 0 and d >= min(64, target):
            return d, 0
    return target, (-B) % target


# ----------------------------------------------------------------------------
# Public forward
# ----------------------------------------------------------------------------
def classification_forward(x, w1, b1, w2, b2, *, compute_dtype=jnp.bfloat16,
                           tb=None, lane=128, max_single_block_batch=128):
    """Pallas forward for Classification: relu(x @ W1 + b1) @ W2 + b2.

    x  : (B, num_inputs)             float32
    w1 : (num_inputs, num_hiddens)   (PyTorch hidden.weight transposed)
    b1 : (num_hiddens,)
    w2 : (num_hiddens, num_outputs)  (PyTorch output.weight transposed)
    b2 : (num_outputs,)
    compute_dtype : dtype fed to the MXU (bf16 recommended); accumulation f32.
    Returns (B, num_outputs) in x.dtype.
    """
    x = jnp.asarray(x)
    out_dtype = x.dtype
    B, num_inputs = x.shape
    num_hiddens = w1.shape[1]
    num_outputs = w2.shape[1]

    phys_vmem = _physical_vmem_bytes()
    sub = _sublane_multiple(compute_dtype)

    # ---- lane-dense output: pad class dim to a multiple of 128 (unmasked vst).
    n_pad = (-num_outputs) % lane
    n_out_p = num_outputs + n_pad
    w2_p = jnp.pad(w2, ((0, 0), (0, n_pad))) if n_pad else w2
    b2_p = jnp.pad(b2, (0, n_pad)) if n_pad else b2

    # ---- batch tiling --------------------------------------------------------
    tb_large = 512 if phys_vmem >= (96 << 20) else 256   # v5e/v6e vs v7x budget
    if tb is None:
        tb, b_pad = _pick_batch_tile(B, max_single_block_batch, tb_large, sub)
    else:
        tb = max(sub, ((tb + sub - 1) // sub) * sub)
        b_pad = (-B) % tb
    Bp = B + b_pad
    # NOTE: padded rows (rare: only when no good divisor of B exists) produce
    # garbage outputs that are sliced off below; never reduce over them.
    x_p = jnp.pad(x, ((0, b_pad), (0, 0))) if b_pad else x
    grid = (Bp // tb,)

    # ---- hidden-dim chunking: bound the (tb, h_chunk) f32 hidden activation.
    if num_hiddens <= 512 or num_hiddens % 128 != 0:
        h_chunk = num_hiddens
    else:
        h_chunk = 512
        while num_hiddens % h_chunk != 0:
            h_chunk -= 128
    num_chunks = num_hiddens // h_chunk

    # ---- dtype prep: low-precision MXU inputs, f32 biases --------------------
    x_c = x_p.astype(compute_dtype)
    w1_c = w1.astype(compute_dtype)
    w2_c = w2_p.astype(compute_dtype)
    b1_2d = b1.astype(jnp.float32).reshape(1, num_hiddens)
    b2_2d = b2_p.astype(jnp.float32).reshape(1, n_out_p)
    # TODO(synk): optional fp8 weight quantization (+ per-channel dequant scale
    # after each dot) for v7x inference at num_inputs/num_hiddens in the 1000s.

    # ---- VMEM accounting (real itemsizes, real buffer multiplicities) --------
    wsize = np.dtype(compute_dtype).itemsize
    osize = np.dtype(out_dtype).itemsize
    weight_bytes = (num_inputs * num_hiddens + num_hiddens * n_out_p) * wsize
    # single-buffer the resident weights only when it actually saves real VMEM
    single_buffer_weights = weight_bytes > (2 << 20) and hasattr(pl, "Buffered")
    wbuf = 1 if single_buffer_weights else 2
    bias_bytes = (num_hiddens + n_out_p) * 4
    vmem_bytes = (
        wbuf * (weight_bytes + bias_bytes)
        + 2 * tb * num_inputs * wsize          # double-buffered x tiles
        + 2 * tb * n_out_p * osize             # double-buffered out tiles
        + tb * n_out_p * 4                     # f32 accumulator scratch
        + 2 * tb * h_chunk * 4                 # hidden-chunk live values headroom
    )
    vmem_limit = int(min(max(int(1.5 * vmem_bytes), 4 << 20),
                         int(0.75 * phys_vmem)))

    def resident_spec(shape):
        # constant index_map -> block stays resident across the whole grid
        if single_buffer_weights:
            try:
                return pl.BlockSpec(shape, lambda i: (0, 0),
                                    pipeline_mode=pl.Buffered(1))
            except TypeError:  # pipeline_mode not available in this jax version
                pass
        return pl.BlockSpec(shape, lambda i: (0, 0))

    flops = 2 * Bp * (num_inputs * num_hiddens + num_hiddens * n_out_p)
    bytes_accessed = (x_c.size * wsize + w1_c.size * wsize + w2_c.size * wsize
                      + b1_2d.size * 4 + b2_2d.size * 4 + Bp * n_out_p * osize)

    out_p = pl.pallas_call(
        _make_mlp_kernel(num_chunks, h_chunk),
        out_shape=jax.ShapeDtypeStruct((Bp, n_out_p), out_dtype),
        grid_spec=pltpu.PrefetchScalarGridSpec(
            num_scalar_prefetch=0,
            grid=grid,
            in_specs=[
                # x: tiled over the batch
                pl.BlockSpec((tb, num_inputs), lambda i: (i, 0)),
                # weights / biases: resident full blocks
                resident_spec((num_inputs, num_hiddens)),
                resident_spec((1, num_hiddens)),
                resident_spec((num_hiddens, n_out_p)),
                resident_spec((1, n_out_p)),
            ],
            out_specs=pl.BlockSpec((tb, n_out_p), lambda i: (i, 0)),
            scratch_shapes=[pltpu.VMEM((tb, n_out_p), jnp.float32)],
        ),
        compiler_params=pltpu.CompilerParams(
            dimension_semantics=("parallel",),
            vmem_limit_bytes=vmem_limit),
        cost_estimate=pl.CostEstimate(flops=flops, transcendentals=0,
                                      bytes_accessed=bytes_accessed),
    )(x_c, w1_c, b1_2d, w2_c, b2_2d)

    # strip batch + lane padding outside the kernel
    return out_p[:B, :num_outputs]


# ----------------------------------------------------------------------------
# Pure-JAX reference
# ----------------------------------------------------------------------------
def reference_forward(x, w1, b1, w2, b2, compute_dtype=None):
    if compute_dtype is None:
        h = jnp.maximum(jnp.dot(x, w1, precision="highest") + b1, 0.0)
        return jnp.dot(h, w2, precision="highest") + b2
    xd, w1d, w2d = (a.astype(compute_dtype) for a in (x, w1, w2))
    h = jnp.dot(xd, w1d, preferred_element_type=jnp.float32) + b1
    h = jnp.maximum(h, 0.0)
    return jnp.dot(h.astype(compute_dtype), w2d,
                   preferred_element_type=jnp.float32) + b2


if __name__ == "__main__":
    # Small deterministic shapes matching Linear(in) -> ReLU -> Linear(out).
    batch = 64
    num_inputs = 256
    num_hiddens = 128
    num_outputs = 10

    key = jax.random.PRNGKey(0)
    kx, k1, kb1, k2, kb2 = jax.random.split(key, 5)

    x = jax.random.normal(kx, (batch, num_inputs), dtype=jnp.float32)

    # PyTorch Linear stores weight as (out, in); build it already transposed to
    # (in, out). Deterministic U(-1/sqrt(in), 1/sqrt(in)) init like nn.Linear.
    bound1 = 1.0 / (num_inputs ** 0.5)
    w1 = jax.random.uniform(k1, (num_inputs, num_hiddens),
                            minval=-bound1, maxval=bound1, dtype=jnp.float32)
    b1 = jax.random.uniform(kb1, (num_hiddens,),
                            minval=-bound1, maxval=bound1, dtype=jnp.float32)
    bound2 = 1.0 / (num_hiddens ** 0.5)
    w2 = jax.random.uniform(k2, (num_hiddens, num_outputs),
                            minval=-bound2, maxval=bound2, dtype=jnp.float32)
    b2 = jax.random.uniform(kb2, (num_outputs,),
                            minval=-bound2, maxval=bound2, dtype=jnp.float32)

    # 1) f32 MXU path — tight check against an f32 reference.
    out_f32 = jax.block_until_ready(
        classification_forward(x, w1, b1, w2, b2, compute_dtype=jnp.float32))
    ref_f32 = jax.block_until_ready(reference_forward(x, w1, b1, w2, b2))
    assert out_f32.shape == (batch, num_outputs)
    assert jnp.allclose(out_f32, ref_f32, atol=1e-3, rtol=1e-3), "f32 mismatch"

    # 2) bf16 MXU path (default, the fast one) — check against a matching bf16
    #    reference, and loosely against the f32 reference.
    out_bf16 = jax.block_until_ready(classification_forward(x, w1, b1, w2, b2))
    ref_bf16 = jax.block_until_ready(
        reference_forward(x, w1, b1, w2, b2, compute_dtype=jnp.bfloat16))
    assert out_bf16.shape == (batch, num_outputs)
    assert jnp.allclose(out_bf16, ref_bf16, atol=2e-2, rtol=2e-2), "bf16 mismatch"
    assert jnp.allclose(out_bf16, ref_f32, atol=5e-2, rtol=5e-2), "bf16 vs f32 drift"

    print("KERNEL_OK")
</pallas_src>

<mosaic_0001>
module attributes {stable_mosaic.version = 11 : i64} {
  func.func @mlp_kernel(%arg0: i32, %arg1: memref<64x256xf32, #tpu.memory_space<vmem>>, %arg2: memref<256x128xf32, #tpu.memory_space<vmem>>, %arg3: memref<1x128xf32, #tpu.memory_space<vmem>>, %arg4: memref<128x128xf32, #tpu.memory_space<vmem>>, %arg5: memref<1x128xf32, #tpu.memory_space<vmem>>, %arg6: memref<64x128xf32, #tpu.memory_space<vmem>>, %arg7: memref<64x128xf32, #tpu.memory_space<vmem>>) attributes {dimension_semantics = [#tpu.dimension_semantics<parallel>], iteration_bounds = array<i64: 1>, scalar_prefetch = 0 : i64, scratch_operands = 1 : i64, tpu.core_type = #tpu.core_type<tc>, window_params = [{transform_indices = @transform_0, window_bounds = array<i64: 64, 256>}, {pipeline_mode = #tpu.pipeline_mode<synchronous>, transform_indices = @transform_1, window_bounds = array<i64: 256, 128>}, {pipeline_mode = #tpu.pipeline_mode<synchronous>, transform_indices = @transform_2, window_bounds = array<i64: 1, 128>}, {pipeline_mode = #tpu.pipeline_mode<synchronous>, transform_indices = @transform_3, window_bounds = array<i64: 128, 128>}, {pipeline_mode = #tpu.pipeline_mode<synchronous>, transform_indices = @transform_4, window_bounds = array<i64: 1, 128>}, {transform_indices = @transform_5, window_bounds = array<i64: 64, 128>}]} {
    %c0 = arith.constant 0 : index
    %c0_0 = arith.constant 0 : index
    %0 = vector.load %arg1[%c0, %c0_0] : memref<64x256xf32, #tpu.memory_space<vmem>>, vector<64x256xf32>
    %cst = arith.constant 0.000000e+00 : f32
    %1 = vector.broadcast %cst : f32 to vector<64x128xf32>
    %c0_1 = arith.constant 0 : index
    %c0_2 = arith.constant 0 : index
    %2 = vector.load %arg7[%c0_1, %c0_2] : memref<64x128xf32, #tpu.memory_space<vmem>>, vector<64x128xf32>
    tpu.vector_store %arg7[%c0_1, %c0_2], %1 {strides = array<i32>} : memref<64x128xf32, #tpu.memory_space<vmem>>, vector<64x128xf32>,
    %c0_3 = arith.constant 0 : index
    %c0_4 = arith.constant 0 : index
    %3 = vector.load %arg2[%c0_3, %c0_4] : memref<256x128xf32, #tpu.memory_space<vmem>>, vector<256x128xf32>
    %cst_5 = arith.constant dense<0.000000e+00> : vector<64x128xf32>
    %4 = tpu.matmul %0, %3, %cst_5 {dimension_numbers = #tpu.dot_dimension_numbers<[1], [0], [0], [1], [0, 0, 1, 1], [], []>} : vector<64x256xf32>, vector<256x128xf32>, vector<64x128xf32> -> vector<64x128xf32>
    %c0_6 = arith.constant 0 : index
    %c0_7 = arith.constant 0 : index
    %5 = vector.load %arg3[%c0_6, %c0_7] : memref<1x128xf32, #tpu.memory_space<vmem>>, vector<1x128xf32>
    %6 = vector.broadcast %5 : vector<1x128xf32> to vector<64x128xf32>
    %7 = arith.addf %4, %6 : vector<64x128xf32>
    %cst_8 = arith.constant 0.000000e+00 : f32
    %8 = vector.broadcast %cst_8 : f32 to vector<64x128xf32>
    %9 = arith.maximumf %7, %8 : vector<64x128xf32>
    %c0_9 = arith.constant 0 : index
    %c0_10 = arith.constant 0 : index
    %10 = vector.load %arg7[%c0_9, %c0_10] : memref<64x128xf32, #tpu.memory_space<vmem>>, vector<64x128xf32>
    %c0_11 = arith.constant 0 : index
    %c0_12 = arith.constant 0 : index
    %11 = vector.load %arg4[%c0_11, %c0_12] : memref<128x128xf32, #tpu.memory_space<vmem>>, vector<128x128xf32>
    %cst_13 = arith.constant dense<0.000000e+00> : vector<64x128xf32>
    %12 = tpu.matmul %9, %11, %cst_13 {dimension_numbers = #tpu.dot_dimension_numbers<[1], [0], [0], [1], [0, 0, 1, 1], [], []>} : vector<64x128xf32>, vector<128x128xf32>, vector<64x128xf32> -> vector<64x128xf32>
    %13 = arith.addf %10, %12 : vector<64x128xf32>
    %c0_14 = arith.constant 0 : index
    %c0_15 = arith.constant 0 : index
    %14 = vector.load %arg7[%c0_14, %c0_15] : memref<64x128xf32, #tpu.memory_space<vmem>>, vector<64x128xf32>
    tpu.vector_store %arg7[%c0_14, %c0_15], %13 {strides = array<i32>} : memref<64x128xf32, #tpu.memory_space<vmem>>, vector<64x128xf32>,
    %c0_16 = arith.constant 0 : index
    %c0_17 = arith.constant 0 : index
    %15 = vector.load %arg7[%c0_16, %c0_17] : memref<64x128xf32, #tpu.memory_space<vmem>>, vector<64x128xf32>
    %c0_18 = arith.constant 0 : index
    %c0_19 = arith.constant 0 : index
    %16 = vector.load %arg5[%c0_18, %c0_19] : memref<1x128xf32, #tpu.memory_space<vmem>>, vector<1x128xf32>
    %17 = vector.broadcast %16 : vector<1x128xf32> to vector<64x128xf32>
    %18 = arith.addf %15, %17 : vector<64x128xf32>
    %c0_20 = arith.constant 0 : index
    %c0_21 = arith.constant 0 : index
    %19 = vector.load %arg6[%c0_20, %c0_21] : memref<64x128xf32, #tpu.memory_space<vmem>>, vector<64x128xf32>
    tpu.vector_store %arg6[%c0_20, %c0_21], %18 {strides = array<i32>} : memref<64x128xf32, #tpu.memory_space<vmem>>, vector<64x128xf32>,
    return
  }
  func.func @transform_0(%arg0: i32) -> (i32, i32) {
    %c0_i32 = arith.constant 0 : i32
    %c0_i32_0 = arith.constant 0 : i32
    return %arg0, %c0_i32 : i32, i32
  }
  func.func @transform_1(%arg0: i32) -> (i32, i32) {
    %c0_i32 = arith.constant 0 : i32
    %c0_i32_0 = arith.constant 0 : i32
    %c0_i32_1 = arith.constant 0 : i32
    return %c0_i32, %c0_i32_0 : i32, i32
  }
  func.func @transform_2(%arg0: i32) -> (i32, i32) {
    %c0_i32 = arith.constant 0 : i32
    %c0_i32_0 = arith.constant 0 : i32
    %c0_i32_1 = arith.constant 0 : i32
    return %c0_i32, %c0_i32_0 : i32, i32
  }
  func.func @transform_3(%arg0: i32) -> (i32, i32) {
    %c0_i32 = arith.constant 0 : i32
    %c0_i32_0 = arith.constant 0 : i32
    %c0_i32_1 = arith.constant 0 : i32
    return %c0_i32, %c0_i32_0 : i32, i32
  }
  func.func @transform_4(%arg0: i32) -> (i32, i32) {
    %c0_i32 = arith.constant 0 : i32
    %c0_i32_0 = arith.constant 0 : i32
    %c0_i32_1 = arith.constant 0 : i32
    return %c0_i32, %c0_i32_0 : i32, i32
  }
  func.func @transform_5(%arg0: i32) -> (i32, i32) {
    %c0_i32 = arith.constant 0 : i32
    %c0_i32_0 = arith.constant 0 : i32
    return %arg0, %c0_i32 : i32, i32
  }
}

</mosaic_0001>

<bundles_post_ra>
// kernel: tpu_custom_call.1
= control target key start
LH: loop header
LB: loop body
LE: loop exit
PB: predicated region body
PF: predicated region fallthrough
CT: control target
= control target key end

     0   :  { %10 = vsyncpa [#allocation4], 0  ;;  %s717_s0 = inlined_call_operand.hbm [shape: f32[64,256], index: 0, kind: input, shape index: {}]   ;;  %s718_s1 = inlined_call_operand.hbm [shape: f32[256,128], index: 1, kind: input, shape index: {}]   ;;  %s719_s2 = inlined_call_operand.vmem [shape: f32[1,128], index: 2, kind: input, shape index: {}]   ;;  %s720_s3 = inlined_call_operand.hbm [shape: f32[128,128], index: 3, kind: input, shape index: {}]   ;;  %s721_s4 = inlined_call_operand.vmem [shape: f32[1,128], index: 4, kind: input, shape index: {}]   ;;  %s722_s5 = inlined_call_operand.hbm [shape: f32[64,128], index: 5, kind: output, shape index: {}]  }
   0x1   :  { %11 = vsyncpa [#allocation7], 0 }
   0x2   :  { %12 = vsyncpa [#allocation5], 0  ;;  %s652_s18 = smov [#allocation6]  }
   0x3   :  { %s30_s19 = sshll.u32 %s652_s18, 4  ;;  %s31_s19 = int_to_ptr.vmem [resolvable:$true] %s30_s19 }
   0x4   :  { %s574_s20 = scalar_lea.vmem %s31_s19, 4096  ;;  %p579_p1 = scmp.lt.s32.totalorder %s31_s19, %s31_s19 }
   0x5   :  { %p575_p0 = scmp.ne.s32.totalorder %s31_s19, %s574_s20  ;;  %p580_p2 = scmp.lt.s32.totalorder %s574_s20, %s574_s20 }
   0x7   :  { %p581_p3 = por %p580_p2, %p579_p1 }
   0x9   :  { %p582_p4 = pnand %p581_p3, %p575_p0 }
   0xb   :  { %585 = shalt.err (!%p582_p4)
}
   0xc   :  { %s653_s21 = smov 128   ;;  %s654_s22 = smov 8  }
   0xd   :  { %36 = dma.hbm_to_vmem [thread:$0]  %s718_s1, 4096, %s31_s19, [#allocation7], %s653_s21, %s653_s21, %s654_s22  }
   0xe   :  { %s655_s25 = smov [#allocation3]  }
   0xf   :  { %s18_s26 = sshll.u32 %s655_s25, 4  ;;  %s19_s26 = int_to_ptr.vmem [resolvable:$true] %s18_s26 }
  0x10   :  { %s594_s27 = scalar_lea.vmem %s19_s26, 2048  ;;  %p599_p6 = scmp.lt.s32.totalorder %s19_s26, %s19_s26 }
  0x11   :  { %p595_p5 = scmp.ne.s32.totalorder %s19_s26, %s594_s27  ;;  %p600_p7 = scmp.lt.s32.totalorder %s594_s27, %s594_s27 }
  0x13   :  { %p601_p8 = por %p600_p7, %p599_p6 }
  0x15   :  { %p602_p9 = pnand %p601_p8, %p595_p5 }
  0x17   :  { %605 = shalt.err (!%p602_p9)
}
  0x18   :  { %s656_s28 = smov 256   ;;  %s657_s29 = smov 16  }
  0x19   :  { %24 = dma.hbm_to_vmem [thread:$0]  %s717_s0, 2048, %s19_s26, [#allocation4], %s656_s28, %s656_s28, %s657_s29  }
  0x1a   :  { %s658_s7 = smov [#allocation8]  }
  0x1b   :  { %s44_s8 = sshll.u32 %s658_s7, 4  ;;  %s45_s8 = int_to_ptr.vmem [resolvable:$true] %s44_s8 }
  0x1c   :  { %s614_s1 = scalar_lea.vmem %s45_s8, 2048  ;;  %p619_p11 = scmp.lt.s32.totalorder %s45_s8, %s45_s8 }
  0x1d   :  { %p615_p10 = scmp.ne.s32.totalorder %s45_s8, %s614_s1  ;;  %p620_p12 = scmp.lt.s32.totalorder %s614_s1, %s614_s1 }
  0x1f   :  { %p621_p13 = por %p620_p12, %p619_p11 }
  0x21   :  { %p622_p0 = pnand %p621_p13, %p615_p10 }
  0x23   :  { %625 = shalt.err (!%p622_p0)
}
  0x24   :  { %50 = dma.hbm_to_vmem [thread:$0]  %s720_s3, 2048, %s45_s8, [#allocation7], %s653_s21, %s653_s21, %s654_s22  }
  0x25   :  { %646 = dma.done.wait [#allocation4], 2048  }
  0x26   :  { %647 = vsyncadd [#allocation4], 4294965248 }
  0x27   :  { %648 = dma.done.wait [#allocation7], 6144  }
  0x28   :  { %649 = vsyncadd [#allocation7], 4294961152  ;;  %v117_v0 = vld [vmem:[#allocation6 + $0xf8] sm:$0xff]  ;;  %v116_v2 = vld [vmem:[#allocation6 + $0xf0] sm:$0xff] }
  0x29   :  { %v101_v1 = vld [vmem:[#allocation6 + $0x78] sm:$0xff]  ;;  %434 = vmatprep.subr.mxu0 %v117_v0  ;;  %v100_v3 = vld [vmem:[#allocation6 + $0x70] sm:$0xff]  ;;  %v115_v4 = vld [vmem:[#allocation6 + $0xe8] sm:$0xff] }
  0x2a   :  { %435 = vmatpush3.msra.mxu0 %v101_v1  ;;  %v99_v5 = vld [vmem:[#allocation6 + $0x68] sm:$0xff]  ;;  %v114_v6 = vld [vmem:[#allocation6 + $0xe0] sm:$0xff]  ;;  %v113_v8 = vld [vmem:[#allocation6 + $0xd8] sm:$0xff] }
  0x2b   :  { %436 = vmatprep.subr.mxu0 %v116_v2  ;;  %v98_v7 = vld [vmem:[#allocation6 + $0x60] sm:$0xff]  ;;  %v97_v9 = vld [vmem:[#allocation6 + $0x58] sm:$0xff]  ;;  %v112_v10 = vld [vmem:[#allocation6 + $0xd0] sm:$0xff] }
  0x2c   :  { %437 = vmatpush3.msra.mxu0 %v100_v3  ;;  %v96_v11 = vld [vmem:[#allocation6 + $0x50] sm:$0xff]  ;;  %v111_v12 = vld [vmem:[#allocation6 + $0xc8] sm:$0xff]  ;;  %v110_v15 = vld [vmem:[#allocation6 + $0xc0] sm:$0xff] }
  0x2d   :  { %438 = vmatprep.subr.mxu0 %v115_v4  ;;  %v63_v13 = vld [vmem:[#allocation3 + $0x8] sm:$0xff]  ;;  %v94_v16 = vld [vmem:[#allocation6 + $0x40] sm:$0xff]  ;;  %v109_v17 = vld [vmem:[#allocation6 + $0xb8] sm:$0xff] }
  0x2e   :  { %439 = vmatpush3.msra.mxu0 %v99_v5  ;;  %v95_v14 = vld [vmem:[#allocation6 + $0x48] sm:$0xff]  ;;  %189 = vmatprep.mubr.f32.mxu0 %v63_v13  ;;  %v93_v18 = vld [vmem:[#allocation6 + $0x38] sm:$0xff]  ;;  %v108_v19 = vld [vmem:[#allocation6 + $0xb0] sm:$0xff] }
  0x2f   :  { %440 = vmatprep.subr.mxu0 %v114_v6  ;;  %v261_v20 = vld [vmem:[#allocation8 + $0x78] sm:$0xff]  ;;  %v260_v21 = vld [vmem:[#allocation8 + $0x70] sm:$0xff]  ;;  %v107_v23 = vld [vmem:[#allocation6 + $0xa8] sm:$0xff] }
  0x30   :  { %441 = vmatpush3.msra.mxu0 %v98_v7  ;;  %v92_v22 = vld [vmem:[#allocation6 + $0x30] sm:$0xff]  ;;  %514 = vmatprep.subr.mxu1 %v261_v20  ;;  %v259_v24 = vld [vmem:[#allocation8 + $0x68] sm:$0xff]  ;;  %v106_v26 = vld [vmem:[#allocation6 + $0xa0] sm:$0xff] }
  0x31   :  { %442 = vmatprep.subr.mxu0 %v113_v8  ;;  %515 = vmatpush3.msra.mxu1 %v261_v20  ;;  %v91_v25 = vld [vmem:[#allocation6 + $0x28] sm:$0xff]  ;;  %v258_v27 = vld [vmem:[#allocation8 + $0x60] sm:$0xff]  ;;  %v105_v29 = vld [vmem:[#allocation6 + $0x98] sm:$0xff] }
  0x32   :  { %443 = vmatpush3.msra.mxu0 %v97_v9  ;;  %516 = vmatprep.subr.mxu1 %v260_v21  ;;  %v90_v28 = vld [vmem:[#allocation6 + $0x20] sm:$0xff]  ;;  %v257_v30 = vld [vmem:[#allocation8 + $0x58] sm:$0xff]  ;;  %v104_v32 = vld [vmem:[#allocation6 + $0x90] sm:$0xff] }
  0x33   :  { %444 = vmatprep.subr.mxu0 %v112_v10  ;;  %517 = vmatpush3.msra.mxu1 %v260_v21  ;;  %v89_v31 = vld [vmem:[#allocation6 + $0x18] sm:$0xff]  ;;  %v256_v33 = vld [vmem:[#allocation8 + $0x50] sm:$0xff]  ;;  %v103_v35 = vld [vmem:[#allocation6 + $0x88] sm:$0xff] }
  0x34   :  { %445 = vmatpush3.msra.mxu0 %v96_v11  ;;  %518 = vmatprep.subr.mxu1 %v259_v24  ;;  %v88_v34 = vld [vmem:[#allocation6 + $0x10] sm:$0xff]  ;;  %v255_v36 = vld [vmem:[#allocation8 + $0x48] sm:$0xff]  ;;  %v102_v38 = vld [vmem:[#allocation6 + $0x80] sm:$0xff] }
  0x35   :  { %446 = vmatprep.subr.mxu0 %v111_v12  ;;  %519 = vmatpush3.msra.mxu1 %v259_v24  ;;  %v87_v37 = vld [vmem:[#allocation6 + $0x8] sm:$0xff]  ;;  %v254_v39 = vld [vmem:[#allocation8 + $0x40] sm:$0xff]  ;;  %v253_v42 = vld [vmem:[#allocation8 + $0x38] sm:$0xff] }
  0x36   :  { %447 = vmatpush3.msra.mxu0 %v95_v14  ;;  %520 = vmatprep.subr.mxu1 %v258_v27  ;;  %v86_v40 = vld [vmem:[#allocation6] sm:$0xff]  ;;  %v65_v43 = vld [vmem:[#allocation3 + $0x18] sm:$0xff]  ;;  %v252_v44 = vld [vmem:[#allocation8 + $0x30] sm:$0xff] }
  0x37   :  { %448 = vmatprep.subr.mxu0 %v110_v15  ;;  %521 = vmatpush3.msra.mxu1 %v258_v27  ;;  %v62_v41 = vld [vmem:[#allocation3] sm:$0xff]  ;;  %v64_v45 = vld [vmem:[#allocation3 + $0x10] sm:$0xff]  ;;  %v67_v46 = vld [vmem:[#allocation3 + $0x28] sm:$0xff] }
  0x38   :  { %449 = vmatpush3.msra.mxu0 %v94_v16  ;;  %522 = vmatprep.subr.mxu1 %v257_v30  ;;  %v66_v47 = vld [vmem:[#allocation3 + $0x20] sm:$0xff]  ;;  %v69_v48 = vld [vmem:[#allocation3 + $0x38] sm:$0xff]  ;;  %v68_v49 = vld [vmem:[#allocation3 + $0x30] sm:$0xff] }
  0x39   :  { %450 = vmatprep.subr.mxu0 %v109_v17  ;;  %523 = vmatpush3.msra.mxu1 %v257_v30  ;;  %v71_v50 = vld [vmem:[#allocation3 + $0x48] sm:$0xff]  ;;  %v70_v51 = vld [vmem:[#allocation3 + $0x40] sm:$0xff]  ;;  %v73_v52 = vld [vmem:[#allocation3 + $0x58] sm:$0xff] }
  0x3a   :  { %451 = vmatpush3.msra.mxu0 %v93_v18  ;;  %524 = vmatprep.subr.mxu1 %v256_v33  ;;  %v72_v53 = vld [vmem:[#allocation3 + $0x50] sm:$0xff]  ;;  %v75_v54 = vld [vmem:[#allocation3 + $0x68] sm:$0xff]  ;;  %v74_v55 = vld [vmem:[#allocation3 + $0x60] sm:$0xff] }
  0x3b   :  { %452 = vmatprep.subr.mxu0 %v108_v19  ;;  %525 = vmatpush3.msra.mxu1 %v256_v33  ;;  %v77_v56 = vld [vmem:[#allocation3 + $0x78] sm:$0xff]  ;;  %v76_v57 = vld [vmem:[#allocation3 + $0x70] sm:$0xff]  ;;  %v251_v58 = vld [vmem:[#allocation8 + $0x28] sm:$0xff] }
  0x3c   :  { %453 = vmatpush3.msra.mxu0 %v92_v22  ;;  %526 = vmatprep.subr.mxu1 %v255_v36  ;;  %v250_v59 = vld [vmem:[#allocation8 + $0x20] sm:$0xff]  ;;  %v249_v60 = vld [vmem:[#allocation8 + $0x18] sm:$0xff]  ;;  %v248_v61 = vld [vmem:[#allocation8 + $0x10] sm:$0xff] }
  0x3d   :  { %454 = vmatprep.subr.mxu0 %v107_v23  ;;  %527 = vmatpush3.msra.mxu1 %v255_v36  ;;  %v247_v62 = vld [vmem:[#allocation8 + $0x8] sm:$0xff]  ;;  %v246_v63 = vld [vmem:[#allocation8] sm:$0xff] }
  0x3e   :  { %455 = vmatpush3.msra.mxu0 %v91_v25  ;;  %528 = vmatprep.subr.mxu1 %v254_v39  ;;  %v432_v2 = vld [vmem:[%s719_s2] ss:$0 sm:$0xff] }
  0x3f   :  { %456 = vmatprep.subr.mxu0 %v106_v26  ;;  %529 = vmatpush3.msra.mxu1 %v254_v39 }
  0x40   :  { %457 = vmatpush3.msra.mxu0 %v90_v28  ;;  %530 = vmatprep.subr.mxu1 %v253_v42 }
  0x41   :  { %458 = vmatprep.subr.mxu0 %v105_v29  ;;  %531 = vmatpush3.msra.mxu1 %v253_v42 }
  0x42   :  { %459 = vmatpush3.msra.mxu0 %v89_v31  ;;  %532 = vmatprep.subr.mxu1 %v252_v44 }
  0x43   :  { %460 = vmatprep.subr.mxu0 %v104_v32  ;;  %533 = vmatpush3.msra.mxu1 %v252_v44 }
  0x44   :  { %461 = vmatpush3.msra.mxu0 %v88_v34  ;;  %534 = vmatprep.subr.mxu1 %v251_v58 }
  0x45   :  { %462 = vmatprep.subr.mxu0 %v103_v35  ;;  %535 = vmatpush3.msra.mxu1 %v251_v58 }
  0x46   :  { %463 = vmatpush3.msra.mxu0 %v87_v37  ;;  %536 = vmatprep.subr.mxu1 %v250_v59 }
  0x47   :  { %464 = vmatprep.subr.mxu0 %v102_v38  ;;  %537 = vmatpush3.msra.mxu1 %v250_v59 }
  0x48   :  { %465 = vmatpush3.msra.mxu0 %v86_v40  ;;  %538 = vmatprep.subr.mxu1 %v249_v60 }
  0x49   :  { %190 = vmatmul.mubr.f32.vlgmr.msra.gmra.mxu0 %v62_v41  ;;  %539 = vmatpush3.msra.mxu1 %v249_v60  ;;  %v433_v41 = vld [vmem:[%s721_s4] ss:$0 sm:$0xff]  ;;  %s659_s4 = smov [#allocation9]  }
  0x4a   :  { %194 = vmatprep.mubr.f32.mxu0 %v65_v43  ;;  %540 = vmatprep.subr.mxu1 %v248_v61  ;;  %s419_s12 = sshll.u32 %s659_s4, 4  ;;  %s420_s12 = int_to_ptr.vmem [resolvable:$true] %s419_s12 }
  0x4b   :  { %541 = vmatpush3.msra.mxu1 %v248_v61  ;;  %s626_s13 = scalar_lea.vmem %s420_s12, 1024  ;;  %p631_p2 = scmp.lt.s32.totalorder %s420_s12, %s420_s12 }
  0x4c   :  { %542 = vmatprep.subr.mxu1 %v247_v62  ;;  %p627_p1 = scmp.ne.s32.totalorder %s420_s12, %s626_s13  ;;  %p632_p3 = scmp.lt.s32.totalorder %s626_s13, %s626_s13 }
  0x4d   :  { %195 = vmatmul.mubr.f32.gmra.mxu0 %v64_v45  ;;  %543 = vmatpush3.msra.mxu1 %v247_v62 }
  0x4e   :  { %199 = vmatprep.mubr.f32.mxu0 %v67_v46  ;;  %544 = vmatprep.subr.mxu1 %v246_v63  ;;  %p633_p4 = por %p632_p3, %p631_p2 }
  0x4f   :  { %545 = vmatpush3.msra.mxu1 %v246_v63 }
  0x50   :  { %p634_p5 = pnand %p633_p4, %p627_p1 }
  0x51   :  { %200 = vmatmul.mubr.f32.gmra.mxu0 %v66_v47 }
  0x52   :  { %204 = vmatprep.mubr.f32.mxu0 %v69_v48 }
  0x55   :  { %205 = vmatmul.mubr.f32.gmra.mxu0 %v68_v49 }
  0x56   :  { %209 = vmatprep.mubr.f32.mxu0 %v71_v50 }
  0x59   :  { %210 = vmatmul.mubr.f32.gmra.mxu0 %v70_v51 }
  0x5a   :  { %214 = vmatprep.mubr.f32.mxu0 %v73_v52 }
  0x5d   :  { %215 = vmatmul.mubr.f32.gmra.mxu0 %v72_v53 }
  0x5e   :  { %219 = vmatprep.mubr.f32.mxu0 %v75_v54 }
  0x61   :  { %220 = vmatmul.mubr.f32.gmra.mxu0 %v74_v55 }
  0x62   :  { %224 = vmatprep.mubr.f32.mxu0 %v77_v56 }
  0x65   :  { %225 = vmatmul.mubr.f32.gmra.mxu0 %v76_v57 }
 0x109   :  { %v466_v0 = vpop.f32.mrf.mxu0 }
 0x10b   :  { %v467_v1 = vpop.f32.mrf.mxu0 }
 0x10c   :  { %v468_v3 = vadd.f32 %v467_v1, %v466_v0 }
 0x10d   :  { %v469_v4 = vpop.f32.mrf.mxu0 }
 0x10e   :  { %v192_v5 = vadd.f32 %v468_v3, %v432_v2 }
 0x10f   :  { %v470_v6 = vpop.f32.mrf.mxu0 }
 0x110   :  { %v471_v7 = vadd.f32 %v470_v6, %v469_v4  ;;  %v230_v8 = vmax.f32 %v192_v5, 0.0 }
 0x111   :  { %v472_v9 = vpop.f32.mrf.mxu0 }
 0x112   :  { %v197_v10 = vadd.f32 %v471_v7, %v432_v2  ;;  %546 = vmatprep.mubr.f32.mxu1 %v230_v8 }
 0x113   :  { %v473_v11 = vpop.f32.mrf.mxu0 }
 0x114   :  { %v231_v12 = vmax.f32 %v197_v10, 0.0  ;;  %v474_v13 = vadd.f32 %v473_v11, %v472_v9 }
 0x115   :  { %v475_v14 = vpop.f32.mrf.mxu0 }
 0x116   :  { %v202_v15 = vadd.f32 %v474_v13, %v432_v2  ;;  %547 = vmatmul.mubr.f32.vlgmr.msra.gmra.mxu1 %v231_v12 }
 0x117   :  { %v476_v16 = vpop.f32.mrf.mxu0 }
 0x118   :  { %v232_v17 = vmax.f32 %v202_v15, 0.0  ;;  %v477_v18 = vadd.f32 %v476_v16, %v475_v14 }
 0x119   :  { %v478_v19 = vpop.f32.mrf.mxu0 }
 0x11a   :  { %v207_v20 = vadd.f32 %v477_v18, %v432_v2  ;;  %549 = vmatprep.mubr.f32.mxu1 %v232_v17 }
 0x11b   :  { %v479_v21 = vpop.f32.mrf.mxu0 }
 0x11c   :  { %v233_v22 = vmax.f32 %v207_v20, 0.0  ;;  %v480_v23 = vadd.f32 %v479_v21, %v478_v19 }
 0x11d   :  { %v481_v24 = vpop.f32.mrf.mxu0 }
 0x11e   :  { %v212_v25 = vadd.f32 %v480_v23, %v432_v2  ;;  %550 = vmatmul.mubr.f32.gmra.mxu1 %v233_v22 }
 0x11f   :  { %v482_v26 = vpop.f32.mrf.mxu0 }
 0x120   :  { %v234_v27 = vmax.f32 %v212_v25, 0.0  ;;  %v483_v28 = vadd.f32 %v482_v26, %v481_v24 }
 0x121   :  { %v484_v29 = vpop.f32.mrf.mxu0 }
 0x122   :  { %v217_v30 = vadd.f32 %v483_v28, %v432_v2  ;;  %552 = vmatprep.mubr.f32.mxu1 %v234_v27 }
 0x123   :  { %v485_v31 = vpop.f32.mrf.mxu0 }
 0x124   :  { %v235_v32 = vmax.f32 %v217_v30, 0.0  ;;  %v486_v33 = vadd.f32 %v485_v31, %v484_v29 }
 0x125   :  { %v487_v34 = vpop.f32.mrf.mxu0 }
 0x126   :  { %v222_v35 = vadd.f32 %v486_v33, %v432_v2  ;;  %553 = vmatmul.mubr.f32.gmra.mxu1 %v235_v32 }
 0x127   :  { %v488_v36 = vpop.f32.mrf.mxu0 }
 0x128   :  { %v236_v37 = vmax.f32 %v222_v35, 0.0  ;;  %v489_v38 = vadd.f32 %v488_v36, %v487_v34 }
 0x12a   :  { %v227_v39 = vadd.f32 %v489_v38, %v432_v2  ;;  %555 = vmatprep.mubr.f32.mxu1 %v236_v37 }
 0x12c   :  { %v237_v40 = vmax.f32 %v227_v39, 0.0 }
 0x12e   :  { %556 = vmatmul.mubr.f32.gmra.mxu1 %v237_v40 }
 0x1d6   :  { %v548_v42 = vpop.f32.mrf.mxu1 }
 0x1d7   :  { %v399_v43 = vadd.f32 %v548_v42, %v433_v41 }
 0x1d8   :  { %v328_v44 = vpop.f32.mrf.mxu1 }
 0x1d9   :  { %407 = vst [vmem:[#allocation9 + $0x8] sm:$0xff] %v399_v43  ;;  %v398_v45 = vadd.f32 %v433_v41, %v328_v44 }
 0x1db   :  { %406 = vst [vmem:[#allocation9] sm:$0xff] %v398_v45 }
 0x1de   :  { %v551_v46 = vpop.f32.mrf.mxu1 }
 0x1df   :  { %v401_v47 = vadd.f32 %v551_v46, %v433_v41 }
 0x1e0   :  { %v338_v48 = vpop.f32.mrf.mxu1 }
 0x1e1   :  { %409 = vst [vmem:[#allocation9 + $0x18] sm:$0xff] %v401_v47  ;;  %v400_v49 = vadd.f32 %v433_v41, %v338_v48 }
 0x1e3   :  { %408 = vst [vmem:[#allocation9 + $0x10] sm:$0xff] %v400_v49 }
 0x1e6   :  { %v554_v50 = vpop.f32.mrf.mxu1 }
 0x1e7   :  { %v403_v51 = vadd.f32 %v554_v50, %v433_v41 }
 0x1e8   :  { %v348_v52 = vpop.f32.mrf.mxu1 }
 0x1e9   :  { %411 = vst [vmem:[#allocation9 + $0x28] sm:$0xff] %v403_v51  ;;  %v402_v53 = vadd.f32 %v433_v41, %v348_v52 }
 0x1eb   :  { %410 = vst [vmem:[#allocation9 + $0x20] sm:$0xff] %v402_v53 }
 0x1ee   :  { %v557_v54 = vpop.f32.mrf.mxu1 }
 0x1ef   :  { %v405_v55 = vadd.f32 %v557_v54, %v433_v41 }
 0x1f0   :  { %v358_v56 = vpop.f32.mrf.mxu1 }
 0x1f1   :  { %413 = vst [vmem:[#allocation9 + $0x38] sm:$0xff] %v405_v55  ;;  %v404_v57 = vadd.f32 %v433_v41, %v358_v56 }
 0x1f3   :  { %412 = vst [vmem:[#allocation9 + $0x30] sm:$0xff] %v404_v57 }
 0x1f4   :  { %637 = shalt.err (!%p634_p5)
}
 0x1f5   :  { %425 = dma.vmem_to_hbm [thread:$0]  %s420_s12, 1024, %s722_s5, [#allocation5], %s653_s21, %s653_s21, %s654_s22  }
 0x1f6   :  { %650 = dma.done.wait [#allocation5], 1024  }
 0x1f7   :  { %651 = vsyncadd [#allocation5], 4294966272 }
 0x1f8   :  { %429 = vsyncpa [#allocation4], 1 }
 0x1f9   :  { %430 = vsyncpa [#allocation7], 1 }
 0x1fa   :  { %431 = vsyncpa [#allocation5], 1 }

</bundles_post_ra>
